<compile_context>
chip_gen: v7x
topology: tpu7x:2x2x1
jax: 0.10.0
libtpu: 0.0.40
codegen_flags: <defaults>
</compile_context>

<pallas_src>
import functools

import jax
import jax.numpy as jnp
from jax.experimental import pallas as pl
from jax.experimental.pallas import tpu as pltpu


def _round_up(x, m):
    return (x + m - 1) // m * m


def _residual_linear_kernel(x_ref, w_ref, b_ref, o_ref, *,
                            compute_dtype, n_col_tiles):
    # x_ref: (TM, D)  native dtype   -- row tile of x (resident across j)
    # w_ref: (D, TN)  compute dtype  -- weight column tile (resident if TN==D)
    # b_ref: (1, TN)  f32            -- bias column tile
    # o_ref: (TM, TN) output dtype
    x = x_ref[...]
    # In-kernel cast to the compute dtype: the VPU cast hides under the MXU
    # and avoids a separate wrapper-side HBM pass over x.
    y = jnp.dot(x.astype(compute_dtype), w_ref[...],
                preferred_element_type=jnp.float32)
    y = y + b_ref[...]                       # f32 bias add (VPU)
    # Residual add with the full-precision x (fn(x) + x semantics).
    if n_col_tiles == 1:
        x_res = x
    else:
        tn = o_ref.shape[-1]
        col0 = pl.multiple_of(pl.program_id(1) * tn, tn)
        x_res = x_ref[:, pl.ds(col0, tn)]
    o_ref[...] = (y + x_res.astype(jnp.float32)).astype(o_ref.dtype)


def residual_linear(x, w, b, *, tm=512, compute_dtype=jnp.bfloat16,
                    out_dtype=None):
    """out = (x @ w + b) + x fused in a single Pallas kernel.

    x: [B, N, D], w: [D, D], b: [D].  Output dtype defaults to x.dtype; pass
    out_dtype=jnp.bfloat16 when the surrounding model runs in bf16 to halve
    the output writeback stream.
    """
    # TODO(synk): Residual.fn is arbitrary in the PyTorch module; a
    # Linear(D, D) fn is instantiated here as the representative block.
    B, N, D = x.shape
    assert w.shape == (D, D) and b.shape == (D,)
    out_dtype = x.dtype if out_dtype is None else out_dtype
    M = B * N

    x2 = x.reshape(M, D)                       # flat [M, D] view, no copy
    w2 = w.astype(compute_dtype)               # one-time tiny parameter cast
    b2 = b.reshape(1, D).astype(jnp.float32)

    x_bytes = jnp.dtype(x.dtype).itemsize
    c_bytes = jnp.dtype(compute_dtype).itemsize
    o_bytes = jnp.dtype(out_dtype).itemsize

    # Row tile: multiple of 8, and small enough that the M grid has >= 2
    # steps (feeds both v7x TensorCores under "parallel").
    tm_eff = max(8, min(tm, _round_up(pl.cdiv(M, 2), 8)))
    m_tiles = pl.cdiv(M, tm_eff)               # partial last block is masked

    # Column-tile the weight only when it is too large to keep VMEM-resident
    # (> ~8 MiB).  Requires a lane-aligned D; smaller/odd widths use the
    # single resident weight tile.
    if D % 128 == 0 and D * D * c_bytes > (8 << 20):
        tn = max(128, ((2 << 20) // (D * c_bytes)) // 128 * 128)
        tn = min(tn, D)
        while D % tn != 0:                     # keep column tiles exact
            tn -= 128
    else:
        tn = D
    n_tiles = D // tn
    resident = n_tiles == 1

    if resident:
        # Constant index_map -> single-buffer the resident operands (halves
        # their VMEM footprint; matters on v7x 64 MiB/TC and v5e's scoped
        # default).
        w_spec = pl.BlockSpec((D, tn), lambda i, j: (0, j),
                              pipeline_mode=pl.Buffered(1))
        b_spec = pl.BlockSpec((1, tn), lambda i, j: (0, j),
                              pipeline_mode=pl.Buffered(1))
        w_bufs = 1
    else:
        w_spec = pl.BlockSpec((D, tn), lambda i, j: (0, j))   # streamed, 2-deep
        b_spec = pl.BlockSpec((1, tn), lambda i, j: (0, j))
        w_bufs = 2

    # Explicit VMEM budget (double-buffered x/out tiles + weight/bias bufs),
    # with headroom; raises v5e's 16 MiB scoped default when needed.
    vmem_needed = (2 * tm_eff * D * x_bytes
                   + w_bufs * D * tn * c_bytes
                   + w_bufs * tn * 4
                   + 2 * tm_eff * tn * o_bytes)
    vmem_limit = max(32 << 20, min(vmem_needed * 3 // 2 + (2 << 20), 112 << 20))

    w_reads = 1 if resident else m_tiles       # weight re-streamed per row tile
    cost = pl.CostEstimate(
        flops=2 * M * D * D + 2 * M * D,
        transcendentals=0,
        bytes_accessed=(M * D * x_bytes        # x read once (resident across j)
                        + w_reads * D * D * c_bytes
                        + D * 4                # bias (f32)
                        + M * D * o_bytes),    # output writeback
    )

    kernel = functools.partial(_residual_linear_kernel,
                               compute_dtype=compute_dtype,
                               n_col_tiles=n_tiles)

    out = pl.pallas_call(
        kernel,
        out_shape=jax.ShapeDtypeStruct((M, D), out_dtype),
        grid_spec=pl.GridSpec(
            grid=(m_tiles, n_tiles),
            in_specs=[
                pl.BlockSpec((tm_eff, D), lambda i, j: (i, 0)),  # x row tile
                w_spec,
                b_spec,
            ],
            out_specs=pl.BlockSpec((tm_eff, tn), lambda i, j: (i, j)),
        ),
        compiler_params=pltpu.CompilerParams(
            # Row tiles independent -> shard across v7x's two TensorCores.
            dimension_semantics=("parallel", "arbitrary"),
            vmem_limit_bytes=vmem_limit,
        ),
        cost_estimate=cost,
    )(x2, w2, b2)

    return out.reshape(B, N, D)


def residual_reference(x, w, b, compute_dtype=jnp.bfloat16):
    # Pure-JAX reference: bf16-rounded matmul operands (matching the kernel's
    # in-kernel cast), f32 accumulation, full-precision residual add.
    xc = x.astype(compute_dtype).astype(jnp.float32)
    wc = w.astype(compute_dtype).astype(jnp.float32)
    y = jnp.einsum("bnd,de->bne", xc, wc,
                   precision=jax.lax.Precision.HIGHEST)
    return (y + b[None, None, :].astype(jnp.float32)
            + x.astype(jnp.float32)).astype(x.dtype)


if __name__ == "__main__":
    key = jax.random.PRNGKey(0)
    k_x, k_w, k_b = jax.random.split(key, 3)

    B, N, D = 2, 8, 32  # small ViT-like shapes: batch=2, tokens=8, hidden=32
    x = jax.random.normal(k_x, (B, N, D), dtype=jnp.float32)
    # Deterministic synthetic parameters (no checkpoint load).
    w = jax.random.normal(k_w, (D, D), dtype=jnp.float32) * 0.02
    b = jax.random.normal(k_b, (D,), dtype=jnp.float32) * 0.02

    # With M=16, TM auto-selects 8 -> a 2-step pipelined grid is exercised.
    out = residual_linear(x, w, b)
    out = jax.block_until_ready(out)

    ref = residual_reference(x, w, b)
    assert out.shape == (B, N, D)
    assert jnp.allclose(out, ref, atol=2e-3, rtol=2e-3), "mismatch vs reference"

    print("KERNEL_OK")
</pallas_src>

<mosaic_0001>
module attributes {stable_mosaic.version = 11 : i64} {
  func.func @_residual_linear_kernel(%arg0: i32, %arg1: i32, %arg2: memref<8x32xf32, #tpu.memory_space<vmem>>, %arg3: memref<32x32xbf16, #tpu.memory_space<vmem>>, %arg4: memref<1x32xf32, #tpu.memory_space<vmem>>, %arg5: memref<8x32xf32, #tpu.memory_space<vmem>>) attributes {dimension_semantics = [#tpu.dimension_semantics<parallel>, #tpu.dimension_semantics<arbitrary>], iteration_bounds = array<i64: 2, 1>, scalar_prefetch = 0 : i64, scratch_operands = 0 : i64, tpu.core_type = #tpu.core_type<tc>, window_params = [{transform_indices = @transform_0, window_bounds = array<i64: 8, 32>}, {pipeline_mode = #tpu.pipeline_mode<synchronous>, transform_indices = @transform_1, window_bounds = array<i64: 32, 32>}, {pipeline_mode = #tpu.pipeline_mode<synchronous>, transform_indices = @transform_2, window_bounds = array<i64: 1, 32>}, {transform_indices = @transform_3, window_bounds = array<i64: 8, 32>}]} {
    %c0 = arith.constant 0 : index
    %c0_0 = arith.constant 0 : index
    %0 = vector.load %arg2[%c0, %c0_0] : memref<8x32xf32, #tpu.memory_space<vmem>>, vector<8x32xf32>
    %1 = arith.truncf %0 : vector<8x32xf32> to vector<8x32xbf16>
    %c0_1 = arith.constant 0 : index
    %c0_2 = arith.constant 0 : index
    %2 = vector.load %arg3[%c0_1, %c0_2] : memref<32x32xbf16, #tpu.memory_space<vmem>>, vector<32x32xbf16>
    %cst = arith.constant dense<0.000000e+00> : vector<8x32xf32>
    %3 = tpu.matmul %1, %2, %cst {dimension_numbers = #tpu.dot_dimension_numbers<[1], [0], [0], [1], [0, 0, 1, 1], [], []>} : vector<8x32xbf16>, vector<32x32xbf16>, vector<8x32xf32> -> vector<8x32xf32>
    %c0_3 = arith.constant 0 : index
    %c0_4 = arith.constant 0 : index
    %4 = vector.load %arg4[%c0_3, %c0_4] : memref<1x32xf32, #tpu.memory_space<vmem>>, vector<1x32xf32>
    %5 = vector.broadcast %4 : vector<1x32xf32> to vector<8x32xf32>
    %6 = arith.addf %3, %5 : vector<8x32xf32>
    %7 = arith.addf %6, %0 : vector<8x32xf32>
    %c0_5 = arith.constant 0 : index
    %c0_6 = arith.constant 0 : index
    %8 = vector.load %arg5[%c0_5, %c0_6] : memref<8x32xf32, #tpu.memory_space<vmem>>, vector<8x32xf32>
    tpu.vector_store %arg5[%c0_5, %c0_6], %7 {strides = array<i32>} : memref<8x32xf32, #tpu.memory_space<vmem>>, vector<8x32xf32>,
    return
  }
  func.func @transform_0(%arg0: i32, %arg1: i32) -> (i32, i32) {
    %c0_i32 = arith.constant 0 : i32
    %c0_i32_0 = arith.constant 0 : i32
    return %arg0, %c0_i32 : i32, i32
  }
  func.func @transform_1(%arg0: i32, %arg1: i32) -> (i32, i32) {
    %c0_i32 = arith.constant 0 : i32
    %c0_i32_0 = arith.constant 0 : i32
    return %c0_i32, %arg1 : i32, i32
  }
  func.func @transform_2(%arg0: i32, %arg1: i32) -> (i32, i32) {
    %c0_i32 = arith.constant 0 : i32
    %c0_i32_0 = arith.constant 0 : i32
    return %c0_i32, %arg1 : i32, i32
  }
  func.func @transform_3(%arg0: i32, %arg1: i32) -> (i32, i32) {
    %c0_i32 = arith.constant 0 : i32
    return %arg0, %arg1 : i32, i32
  }
}

</mosaic_0001>

<bundles_post_ra>
// kernel: tpu_custom_call.1
= control target key start
LH: loop header
LB: loop body
LE: loop exit
PB: predicated region body
PF: predicated region fallthrough
CT: control target
= control target key end

     0   :  { %8 = vsyncpa [#allocation3], 0  ;;  %s926_s0 = inlined_call_operand.hbm [shape: f32[16,32], index: 0, kind: input, shape index: {}]   ;;  %s927_s1 = inlined_call_operand.hbm [shape: bf16[32,32], index: 1, kind: input, shape index: {}]   ;;  %s928_s2 = inlined_call_operand.vmem [shape: f32[1,32], index: 2, kind: input, shape index: {}]   ;;  %s929_s3 = inlined_call_operand.hbm [shape: f32[16,32], index: 3, kind: output, shape index: {}]  }
   0x1   :  { %10 = vsyncpa [#allocation3 + $0x1], 0 }
   0x2   :  { %11 = vsyncpa [#allocation6], 0 }
   0x3   :  { %12 = vsyncpa [#allocation4], 0 }
   0x4   :  { %14 = vsyncpa [#allocation4 + $0x1], 0  ;;  %s709_s12 = smov 0   ;;  %s711_s13 = smov 0  }
   0x5   :  { %s713_s14 = smov 0   ;;  %s715_s15 = smov 0  }
   0x6   :  { %s717_s16 = smov 0   ;;  %s719_s17 = smov 0  }
   0x7 LB: > { %s426_s18 = sadd.s32 4294967295, %s680_s17   ;;  %s427_s19 = sadd.s32 4294967294, %s680_s17   ;;  %s680_s17 = sphi %s719_s17, %s20_s17   ;;  %s676_s16 = sphi %s717_s16, %s953_s16   ;;  %s672_s15 = sphi %s715_s15, %s952_s15   ;;  %s668_s14 = sphi %s713_s14, %s951_s14   ;;  %s664_s13 = sphi %s711_s13, %s950_s13   ;;  %s660_s12 = sphi %s709_s12, %s949_s12  }
   0x8   : > { %p52_p0 = scmp.ne.s32.totalorder %s664_s13, %s660_s12  ;;  %p743_p1 = scmp.eq.s32.totalorder %s426_s18, 0 }
   0x9   : > { %p747_p2 = scmp.eq.s32.totalorder %s426_s18, 1  ;;  %p136_p3 = scmp.eq.s32.totalorder %s427_s19, 1 }
   0xa   : > { %s934_s20 = scalar_select %p743_p1, 1, 0 }
   0xb   : > { %s935_s21 = scalar_select %p747_p2, 1, 0 }
   0xc   : > { %p753_p4 = por %p743_p1, %p52_p0  ;;  %p428_p5 = scmp.ge.s32.totalorder %s680_s17, 1 }
   0xd   : > { %p758_p6 = por %p136_p3, %p52_p0  ;;  %p143_p7 = scmp.lt.s32.totalorder %s680_s17, 3 }
   0xe   : > { %s936_s22 = scalar_select %p753_p4, 1, 0 }
   0xf   : > { %s937_s23 = scalar_select %p758_p6, 1, 0 }
  0x10   : > { %p763_p8 = pnand %p428_p5, %p143_p7  ;;  %s682_s25 = smov [#allocation5]  }
  0x11   : > { %s157_s26 = sshll.u32 %s682_s25, 4  ;;  %s32_s28 = sadd.s32 1, %s676_s16  ;;  %s158_s26 = int_to_ptr.vmem [resolvable:$true] %s157_s26 }
  0x12   : > { %s938_s24 = scalar_select %p763_p8, 1, 0 }
  0x13   : > { %p465_p9 = pneg %p763_p8  ;;  %s536_s4 = scalar_lea.hbm %s927_s1, 256 }
  0x14   : > { %p537_p12 = scmp.ne.s32.totalorder %s927_s1, %s536_s4  ;;  %p543_p5 = scmp.lt.u32.totalorder %s536_s4, %s927_s1 }
  0x15   : > { %p772_p11 = pnand %p465_p9, %p743_p1 }
  0x17   : > { %p538_p13 = pneg %p772_p11 }
  0x19   : > { %p539_p0 = pnand %p538_p13, %p537_p12 }
  0x1b   : > { %p540_p3 = pneg %p539_p0 }
  0x1d   : > { %p545_p7 = pnand %p543_p5, %p540_p3 }
  0x1f   : > { %548 = shalt.err (!%p545_p7)
}
  0x20   : > { %s549_s9 = scalar_lea.vmem %s158_s26, 256  ;;  %p557_p1 = scmp.lt.s32.totalorder %s158_s26, %s158_s26 }
  0x21   : > { %p550_p9 = scmp.ne.s32.totalorder %s158_s26, %s549_s9  ;;  %p558_p4 = scmp.lt.s32.totalorder %s549_s9, %s549_s9 }
  0x23   : > { %p552_p10 = pnand %p550_p9, %p538_p13  ;;  %p559_p8 = por %p558_p4, %p557_p1 }
  0x25   : > { %p553_p6 = pneg %p552_p10 }
  0x27   : > { %p560_p2 = pnand %p559_p8, %p553_p6 }
  0x29   : > { %563 = shalt.err (!%p560_p2)
}
  0x2a   : > { %s683_s10 = smov 64   ;;  %s684_s11 = smov 4  }
  0x2b   : > { %468 = dma.hbm_to_vmem [thread:$0]  (!%p772_p11), %s927_s1, 256, %s158_s26, [#allocation6], %s683_s10, %s683_s10, %s684_s11  }
  0x2c   : > { %p34_p1 = scmp.ge.s32.totalorder %s32_s28, 2  ;;  %s39_s25 = sadd.s32 1, %s668_s14 }
  0x2d   : > { %p46_p2 = scmp.ne.s32.totalorder %s668_s14, %s664_s13  ;;  %p47_p4 = scmp.eq.s32.totalorder %s680_s17, 0 }
  0x2e   : > { %s955_s28 = smov (%p34_p1, %s32_s28), 0  ;;  %p941_p8 = scmp.ne.s32.totalorder %s935_s21, 0 }
  0x2f   : > { %p799_p6 = por %p47_p4, %p46_p2  ;;  %s36_s27 = ssub.s32 %s676_s16, %s955_s28 }
  0x30   : > { %p805_p10 = por %p941_p8, %p46_p2  ;;  %p478_p12 = scmp.lt.s32.totalorder %s680_s17, 2 }
  0x31   : > { %p37_p11 = scmp.eq.s32.totalorder %s36_s27, 0  ;;  %s177_s26 = sand.u32 1, %s668_s14  }
  0x32   : > { %s432_s4 = sshll.u32 %s177_s26, 3  ;;  %s433_s6 = sshll.u32 %s676_s16, 7 }
  0x33   : > { %s814_s5 = scalar_select %p37_p11, %s668_s14, %s39_s25  }
  0x34   : > { %s820_s9 = scalar_lea.hbm %s926_s0, %s433_s6  ;;  %s181_s21 = scalar_lea.vmem [#allocation2], %s432_s4 }
  0x35   : > { %s188_s10 = sshll.u32 %s181_s21, 4  ;;  %p826_p13 = pnand %p478_p12, %p799_p6  ;;  %s822_s10 = int_to_ptr.vmem [resolvable:$true] %s188_s10 }
  0x36   : > { %s178_s18 = scalar_lea.sflag [#allocation3], %s177_s26  ;;  %s564_s19 = scalar_lea.hbm %s820_s9, 128 }
  0x37   : > { %p565_p0 = scmp.ne.s32.totalorder %s820_s9, %s564_s19  ;;  %p566_p3 = pneg %p826_p13 }
  0x38   : > { %s569_s4 = scalar_lea.hbm %s926_s0, 256  ;;  %p570_p9 = scmp.lt.u32.totalorder %s820_s9, %s926_s0 }
  0x39   : > { %p567_p5 = pnand %p566_p3, %p565_p0  ;;  %p571_p1 = scmp.lt.u32.totalorder %s569_s4, %s564_s19 }
  0x3a   : > { %p573_p4 = scmp.lt.u32.totalorder %s564_s19, %s820_s9 }
  0x3b   : > { %p568_p7 = pneg %p567_p5  ;;  %p572_p2 = por %p571_p1, %p570_p9 }
  0x3d   : > { %p574_p6 = por %p573_p4, %p572_p2 }
  0x3f   : > { %p575_p8 = pnand %p574_p6, %p568_p7 }
  0x41   : > { %578 = shalt.err (!%p575_p8)
}
  0x42   : > { %s579_s26 = scalar_lea.vmem %s822_s10, 128  ;;  %s685_s7 = smov [#allocation2]  }
  0x43   : > { %p580_p12 = scmp.ne.s32.totalorder %s822_s10, %s579_s26  ;;  %s584_s8 = sshll.u32 %s685_s7, 4  ;;  %s585_s8 = int_to_ptr.vmem [resolvable:$false] %s584_s8 }
  0x44   : > { %s586_s21 = scalar_lea.vmem %s585_s8, 256  ;;  %p587_p5 = scmp.lt.s32.totalorder %s822_s10, %s585_s8 }
  0x45   : > { %p582_p11 = pnand %p580_p12, %p566_p3  ;;  %p588_p9 = scmp.lt.s32.totalorder %s586_s21, %s579_s26 }
  0x47   : > { %p583_p0 = pneg %p582_p11  ;;  %p589_p1 = por %p588_p9, %p587_p5 }
  0x49   : > { %p590_p2 = pnand %p589_p1, %p583_p0 }
  0x4b   : > { %593 = shalt.err (!%p590_p2)
}
  0x4c   : > { %472 = dma.hbm_to_vmem [thread:$0]  (!%p826_p13), %s820_s9, 128, %s822_s10, %s178_s18  }
  0x4d   : > { %p944_p7 = scmp.ne.s32.totalorder %s938_s24, 0 }
  0x4e   : > { %s858_s19 = sand.u32 (!%p944_p7), 1, %s664_s13   ;;  %p945_p3 = scmp.ne.s32.totalorder (!%p944_p7), %s936_s22, 0 }
  0x4f   : > { %197 = sbr.rel (%p944_p7) target bundleno = 329 (0x149), region = 32  ;;  %s435_s25 = sshll.u32 (!%p944_p7), %s858_s19, 3 }
  0x50   : > { %s200_s27 = scalar_lea.sflag (!%p944_p7), [#allocation3], %s858_s19  ;;  %s203_s4 = scalar_lea.vmem (!%p944_p7), [#allocation2], %s435_s25 }
  0x56   : > { %647 = dma.done.wait (%p945_p3), %s200_s27, 128  }
  0x57   : > { %649 = vsyncadd (%p945_p3), %s200_s27, 4294967168  ;;  %p946_p4 = scmp.ne.s32.totalorder %s934_s20, 0 }
  0x59   : > { %651 = dma.done.wait (%p946_p4), [#allocation6], 256  }
  0x5a   : > { %653 = vsyncadd (%p946_p4), [#allocation6], 4294967040  ;;  %v686_v0 = vmov 0.0   ;;  %vm687_vm0 = vmmov 0   ;;  %v534_v1 = vld [vmem:[#allocation5] sm:$0xff]   ;;  %v535_v2 = vld [vmem:[#allocation5 + $0x8] sm:$0xff]  }
  0x5b   : > { %449 = vmatprep.subr.bf16.mxu0 %v686_v0  ;;  %453 = vmatprep.mubr.msk.bf16.mxu0 %vm687_vm0, %v686_v0  ;;  %v237_v3 = vld [vmem:[%s203_s4] sm:$0xff]  ;;  %vm262_vm1 = vcmask 261120   ;;  %s443_s20 = sshll.u32 %s672_s15, 7  ;;  %s232_s9 = scalar_lea.vmem [#allocation7], %s435_s25 }
  0x5c   : > { %450 = vmatpush3.bf16.msra.mxu0 %v534_v1  ;;  %v238_v4 = vpack.c.bf16 %v237_v3, %v237_v3  ;;  %v438_v5 = vld [vmem:[%s928_s2] ss:$0 sm:$0xff]  ;;  %s323_s10 = sshll.u32 %s232_s9, 4  ;;  %s877_s29 = scalar_lea.hbm %s929_s3, %s443_s20  ;;  %s879_s10 = int_to_ptr.vmem [resolvable:$true] %s323_s10 }
  0x5d   : > { %451 = vmatprep.subr.bf16.mxu0 %v686_v0  ;;  %s309_s6 = scalar_lea.sflag [#allocation4], %s858_s19  ;;  %s594_s15 = scalar_lea.vmem %s879_s10, 128 }
  0x5e   : > { %p595_p13 = scmp.ne.s32.totalorder %s879_s10, %s594_s15  ;;  %s688_s26 = smov [#allocation7]  }
  0x5f   : > { %s598_s7 = sshll.u32 %s688_s26, 4  ;;  %s599_s7 = int_to_ptr.vmem [resolvable:$false] %s598_s7 }
  0x60   : > { %452 = vmatpush3.bf16.msra.mxu0 %v535_v2  ;;  %p596_p6 = pnand %p595_p13, %p805_p10  ;;  %s600_s8 = scalar_lea.vmem %s599_s7, 256 }
  0x61   : > { %p601_p12 = scmp.lt.s32.totalorder %s879_s10, %s599_s7  ;;  %p602_p11 = scmp.lt.s32.totalorder %s600_s8, %s594_s15 }
  0x62   : > { %p597_p8 = pneg %p596_p6 }
  0x63   : > { %454 = vmatmul.mubr.msk.bf16.vlgmr.msra.gmra.mrb[0].mxu0 %vm262_vm1, %v238_v4  ;;  %p603_p0 = por %p602_p11, %p601_p12 }
  0x65   : > { %p604_p5 = pnand %p603_p0, %p597_p8 }
 0x136   : > { %v300_v6 = vpop.f32.mrb[0].mxu0 }
 0x137   : > { %v301_v7 = vadd.f32 %v438_v5, %v300_v6  ;;  %v455_v8 = vpop.f32.mrb[1].mxu0 }
 0x138   : > { %v303_v9 = vpop.f32.mrb[2].mxu0 }
 0x139   : > { %v306_v10 = vadd.f32 %v301_v7, %v237_v3  ;;  %v456_v11 = vpop.f32.mrb[3].mxu0 }
 0x13b   : > { %307 = vst.msk [vmem:[%s232_s9] sm:$0xff] %vm262_vm1, %v306_v10 }
 0x13c   : > { %607 = shalt.err (!%p604_p5)
}
 0x13d   : > { %s608_s21 = scalar_lea.hbm %s877_s29, 128  ;;  %s612_s27 = scalar_lea.hbm %s929_s3, 256 }
 0x13e   : > { %p609_p9 = scmp.ne.s32.totalorder %s877_s29, %s608_s21  ;;  %p613_p7 = scmp.lt.u32.totalorder %s877_s29, %s929_s3 }
 0x13f   : > { %p614_p3 = scmp.lt.u32.totalorder %s612_s27, %s608_s21  ;;  %p616_p13 = scmp.lt.u32.totalorder %s608_s21, %s877_s29 }
 0x140   : > { %p610_p1 = pnand %p609_p9, %p805_p10 }
 0x141   : > { %p615_p4 = por %p614_p3, %p613_p7 }
 0x142   : > { %p611_p2 = pneg %p610_p1 }
 0x143   : > { %p617_p6 = por %p616_p13, %p615_p4 }
 0x145   : > { %p618_p8 = pnand %p617_p6, %p611_p2 }
 0x147   : > { %621 = shalt.err (!%p618_p8)
}
 0x148   : > { %463 = dma.vmem_to_hbm [thread:$0]  (%p805_p10), %s879_s10, 128, %s877_s29, %s309_s6  }
 0x149 PF: > { %s335_s24 = sand.u32 1, %s660_s12   ;;  %p947_p12 = scmp.ne.s32.totalorder %s937_s23, 0 }
 0x14a   : > { %p948_p11 = scmp.ge.s32.totalorder %s680_s17, 2  ;;  %s336_s20 = scalar_lea.sflag [#allocation4], %s335_s24 }
 0x14c   : > { %p474_p0 = pnand %p948_p11, %p947_p12 }
 0x14e   : > { %655 = dma.done.wait (!%p474_p0), %s336_s20, 128  }
 0x14f   : > { %657 = vsyncadd (!%p474_p0), %s336_s20, 4294967168  ;;  %s20_s17 = sadd.s32 1, %s680_s17   ;;  %s949_s12 = smov %s664_s13 }
 0x150   : > { %p17_p5 = scmp.ge.s32.totalorder %s20_s17, 4   ;;  %s950_s13 = smov %s668_s14 }
 0x151   : > { %s951_s14 = smov %s814_s5  ;;  %s952_s15 = smov %s676_s16 }
 0x152   : > { %s953_s16 = smov %s955_s28  ;;  %19 = sbr.rel (!%p17_p5) target bundleno = 7 (0x7), region = 85 }
 0x159   :  { %341 = vsyncpa [#allocation3], 1 }
 0x15a   :  { %343 = vsyncpa [#allocation3 + $0x1], 1 }
 0x15b   :  { %344 = vsyncpa [#allocation6], 1 }
 0x15c   :  { %345 = vsyncpa [#allocation4], 1 }
 0x15d   :  { %347 = vsyncpa [#allocation4 + $0x1], 1 }

</bundles_post_ra>
